<compile_context>
chip_gen: v6e
topology: v6e:2x2x1
jax: 0.10.0
libtpu: 0.0.40
codegen_flags: <defaults>
</compile_context>

<pallas_src>
import math

import jax
import jax.numpy as jnp
from jax.experimental import pallas as pl
from jax.experimental.pallas import tpu as pltpu


# ---------------------------------------------------------------------------
# Kernel: element-wise add of the (VMEM-resident) positional table.
# ---------------------------------------------------------------------------
def _add_pe_kernel(x_ref, pe_ref, o_ref):
    # x_ref: (TB, TL), pe_ref: (1, TL) -> broadcast add over the batch-row axis.
    o_ref[...] = (x_ref[...] + pe_ref[...]).astype(o_ref.dtype)


# ---------------------------------------------------------------------------
# Host-side helpers.
# ---------------------------------------------------------------------------
def _build_pe(seq_len: int, emb_dim: int, d: int) -> jax.Array:
    """Sinusoidal table, same formula as the PyTorch module; sliced to the first d cols."""
    position = jnp.arange(seq_len, dtype=jnp.float32)[:, None]               # (S, 1)
    div_term = jnp.exp(
        jnp.arange(0, emb_dim, 2, dtype=jnp.float32) / emb_dim * math.log(10000.0)
    )                                                                        # (ceil(E/2),)
    angles = position / div_term                                             # (S, ceil(E/2))
    pe = jnp.zeros((seq_len, emb_dim), dtype=jnp.float32)
    pe = pe.at[:, 0::2].set(jnp.sin(angles))
    pe = pe.at[:, 1::2].set(jnp.cos(angles)[:, : emb_dim // 2])
    return pe[:, :d]                                                         # (S, d)


def _round_up(v: int, m: int) -> int:
    return -(-v // m) * m


def _vmem_budget_and_limit():
    """(per-step data budget, vmem_limit_bytes) derived from the chip's VMEM capacity."""
    try:
        cap = int(pltpu.get_tpu_info().vmem_capacity_bytes)
    except Exception:
        cap = 64 << 20                           # conservative: v7x per-TensorCore VMEM
    limit = min(cap * 3 // 4, 96 << 20)          # 96 MiB on v5e/v6e, 48 MiB on v7x
    budget = min(limit - (8 << 20), 64 << 20)    # headroom for compiler scratch etc.
    return max(budget, 4 << 20), limit


def _pick_tiles(B, L, itemsize, sub, budget, split_threshold=2 << 20):
    """Choose a (TB, TL) block for the (B, L) element-wise add.

    VMEM cost model per grid step (conservative: pe counted double-buffered and padded to
    the native sublane tile, x and out double-buffered by the pipeline):
        2*TB*TL*isz (x) + 2*TB*TL*isz (out) + 2*(32/isz)*TL*isz (pe)
      = 4*TB*TL*isz + 64*TL   bytes.
    Blocks stay lane-dense (TL == L or a multiple of 128); TB is either the full batch
    or a multiple of the dtype's native sublane count.
    """
    total = B * L * itemsize

    def cost(tb, tl):
        return 4 * tb * tl * itemsize + 64 * tl

    tb, tl = B, L
    if cost(B, L) > budget:
        if cost(min(B, sub), L) <= budget:
            # Full (lane-dense) rows fit: tile the batch axis only.
            tb = (budget - 64 * L) // (4 * L * itemsize) // sub * sub
            tb = max(min(B, sub), min(tb, B))
        else:
            # Rows too big: minimal batch tile, chunk the lane axis in multiples of 128.
            tb = min(B, sub)
            tl = budget // (4 * tb * itemsize + 64) // 128 * 128
            tl = max(128, min(tl, _round_up(L, 128)))

    # v7x megacore: sizable problems should produce >= 2 parallel blocks so both
    # TensorCores get work (single-TC v5e/v6e unaffected).
    if tb >= B and tl >= L and total > split_threshold:
        half_b = _round_up(pl.cdiv(B, 2), sub)
        half_l = _round_up(pl.cdiv(L, 2), 128)
        if half_b < B:
            tb = half_b
        elif half_l < L:
            tl = half_l
    return tb, tl


def positional_encoding(x: jax.Array, emb_dim: int, *,
                        force_pallas: bool = False,
                        min_pallas_bytes: int = 256 << 10) -> jax.Array:
    """x: (B, S, D) with D <= emb_dim (matches the PyTorch pe[:, :x.size(-1)] slice)."""
    B, S, D = x.shape
    assert D <= emb_dim, "last dim of x must be <= emb_dim"

    # Positional table computed once; cast to x.dtype so the kernel is a same-dtype add.
    pe = _build_pe(S, emb_dim, D).astype(x.dtype)                 # (S, D)

    itemsize = jnp.dtype(x.dtype).itemsize
    if not force_pallas and B * S * D * itemsize < min_pallas_bytes:
        # Sub-tile problem: fixed pallas_call/DMA setup dominates; a fused XLA add wins.
        return x + pe

    L = S * D
    x2 = x.reshape(B, L)
    pe2 = pe.reshape(1, L)

    sub = max(8, 32 // itemsize)        # native sublane multiple: 8 f32 / 16 bf16 / 32 i8
    budget, vmem_limit = _vmem_budget_and_limit()
    TB, TL = _pick_tiles(B, L, itemsize, sub, budget)
    nl = pl.cdiv(L, TL)
    nb = pl.cdiv(B, TB)

    def run(pe_single_buffered: bool):
        pe_kwargs = {"pipeline_mode": pl.Buffered(1)} if pe_single_buffered else {}
        return pl.pallas_call(
            _add_pe_kernel,
            out_shape=jax.ShapeDtypeStruct((B, L), x.dtype),
            grid=(nl, nb),              # batch innermost -> pe tile stays resident
            in_specs=[
                pl.BlockSpec((TB, TL), lambda l, b: (b, l)),              # x tile
                pl.BlockSpec((1, TL), lambda l, b: (0, l), **pe_kwargs),  # pe tile
            ],
            out_specs=pl.BlockSpec((TB, TL), lambda l, b: (b, l)),
            input_output_aliases={0: 0},   # output reuses x2's HBM buffer when donatable
            compiler_params=pltpu.CompilerParams(
                dimension_semantics=("parallel", "parallel"),
                vmem_limit_bytes=vmem_limit),
        )(x2, pe2)

    try:
        # pe's block index only changes on the outer lane axis, so single-buffer it and
        # free up to ~8 MiB of (sublane-padded) VMEM for larger x/out tiles.
        out2 = run(pe_single_buffered=True)
    except Exception:
        # Fallback for Pallas versions without pipeline_mode support; the VMEM budget
        # already accounts for a double-buffered pe, so this configuration still fits.
        out2 = run(pe_single_buffered=False)

    return out2.reshape(B, S, D)


# ---------------------------------------------------------------------------
# Pure-JAX reference (mirror of the PyTorch forward) for correctness checking.
# ---------------------------------------------------------------------------
def _reference(x: jax.Array, emb_dim: int) -> jax.Array:
    B, S, D = x.shape
    position = jnp.arange(0.0, S, dtype=jnp.float32)[:, None]
    div_term = jnp.exp(jnp.arange(0.0, emb_dim, 2, dtype=jnp.float32)
                       / emb_dim * math.log(10000.0))
    pe = jnp.zeros((S, emb_dim), dtype=jnp.float32)
    pe = pe.at[:, 0::2].set(jnp.sin(position / div_term))
    pe = pe.at[:, 1::2].set(jnp.cos(position / div_term)[:, : emb_dim // 2])
    return (x + pe[:, :D]).astype(x.dtype)

# TODO(synk): the PyTorch module's register_buffer('pe', ...) side effect (module state)
# has no functional-JAX equivalent; pe is recomputed per call, same as the module's forward.


if __name__ == "__main__":
    key = jax.random.PRNGKey(0)
    B, S, emb_dim = 2, 8, 32                     # x: (batch, seq, emb_dim)
    x = jax.random.normal(key, (B, S, emb_dim), dtype=jnp.float32)

    ref = _reference(x, emb_dim)

    # Pallas kernel path (forced: this test input is below the XLA-fallback size cutoff).
    out = jax.block_until_ready(positional_encoding(x, emb_dim, force_pallas=True))
    assert out.shape == x.shape and out.dtype == x.dtype
    assert jnp.allclose(out, ref, atol=1e-5, rtol=1e-5), "pallas path mismatch vs reference"

    # Default path for tiny inputs (fused XLA add short-circuit) must match too.
    out_small = jax.block_until_ready(positional_encoding(x, emb_dim))
    assert jnp.allclose(out_small, ref, atol=1e-5, rtol=1e-5), "fallback path mismatch"

    print("KERNEL_OK")
</pallas_src>

<mosaic_0001>
module attributes {stable_mosaic.version = 11 : i64} {
  func.func @_add_pe_kernel(%arg0: i32, %arg1: i32, %arg2: memref<2x256xf32, #tpu.memory_space<vmem>>, %arg3: memref<1x256xf32, #tpu.memory_space<vmem>>, %arg4: memref<2x256xf32, #tpu.memory_space<vmem>>) attributes {dimension_semantics = [#tpu.dimension_semantics<parallel>, #tpu.dimension_semantics<parallel>], iteration_bounds = array<i64: 1, 1>, scalar_prefetch = 0 : i64, scratch_operands = 0 : i64, tpu.core_type = #tpu.core_type<tc>, window_params = [{transform_indices = @transform_0, window_bounds = array<i64: 2, 256>}, {pipeline_mode = #tpu.pipeline_mode<synchronous>, transform_indices = @transform_1, window_bounds = array<i64: 1, 256>}, {transform_indices = @transform_2, window_bounds = array<i64: 2, 256>}]} {
    %c0 = arith.constant 0 : index
    %c0_0 = arith.constant 0 : index
    %0 = vector.load %arg2[%c0, %c0_0] : memref<2x256xf32, #tpu.memory_space<vmem>>, vector<2x256xf32>
    %c0_1 = arith.constant 0 : index
    %c0_2 = arith.constant 0 : index
    %1 = vector.load %arg3[%c0_1, %c0_2] : memref<1x256xf32, #tpu.memory_space<vmem>>, vector<1x256xf32>
    %2 = vector.broadcast %1 : vector<1x256xf32> to vector<2x256xf32>
    %3 = arith.addf %0, %2 : vector<2x256xf32>
    %c0_3 = arith.constant 0 : index
    %c0_4 = arith.constant 0 : index
    %4 = vector.load %arg4[%c0_3, %c0_4] : memref<2x256xf32, #tpu.memory_space<vmem>>, vector<2x256xf32>
    tpu.vector_store %arg4[%c0_3, %c0_4], %3 {strides = array<i32>} : memref<2x256xf32, #tpu.memory_space<vmem>>, vector<2x256xf32>,
    return
  }
  func.func @transform_0(%arg0: i32, %arg1: i32) -> (i32, i32) {
    %c0_i32 = arith.constant 0 : i32
    return %arg1, %arg0 : i32, i32
  }
  func.func @transform_1(%arg0: i32, %arg1: i32) -> (i32, i32) {
    %c0_i32 = arith.constant 0 : i32
    %c0_i32_0 = arith.constant 0 : i32
    return %c0_i32, %arg0 : i32, i32
  }
  func.func @transform_2(%arg0: i32, %arg1: i32) -> (i32, i32) {
    %c0_i32 = arith.constant 0 : i32
    return %arg1, %arg0 : i32, i32
  }
}

module attributes {stable_mosaic.version = 11 : i64} {
  func.func @_add_pe_kernel(%arg0: i32, %arg1: i32, %arg2: memref<2x256xf32, #tpu.memory_space<vmem>>, %arg3: memref<1x256xf32, #tpu.memory_space<vmem>>, %arg4: memref<2x256xf32, #tpu.memory_space<vmem>>) attributes {dimension_semantics = [#tpu.dimension_semantics<parallel>, #tpu.dimension_semantics<parallel>], iteration_bounds = array<i64: 1, 1>, scalar_prefetch = 0 : i64, scratch_operands = 0 : i64, tpu.core_type = #tpu.core_type<tc>, window_params = [{transform_indices = @transform_0, window_bounds = array<i64: 2, 256>}, {transform_indices = @transform_1, window_bounds = array<i64: 1, 256>}, {transform_indices = @transform_2, window_bounds = array<i64: 2, 256>}]} {
    %c0 = arith.constant 0 : index
    %c0_0 = arith.constant 0 : index
    %0 = vector.load %arg2[%c0, %c0_0] : memref<2x256xf32, #tpu.memory_space<vmem>>, vector<2x256xf32>
    %c0_1 = arith.constant 0 : index
    %c0_2 = arith.constant 0 : index
    %1 = vector.load %arg3[%c0_1, %c0_2] : memref<1x256xf32, #tpu.memory_space<vmem>>, vector<1x256xf32>
    %2 = vector.broadcast %1 : vector<1x256xf32> to vector<2x256xf32>
    %3 = arith.addf %0, %2 : vector<2x256xf32>
    %c0_3 = arith.constant 0 : index
    %c0_4 = arith.constant 0 : index
    %4 = vector.load %arg4[%c0_3, %c0_4] : memref<2x256xf32, #tpu.memory_space<vmem>>, vector<2x256xf32>
    tpu.vector_store %arg4[%c0_3, %c0_4], %3 {strides = array<i32>} : memref<2x256xf32, #tpu.memory_space<vmem>>, vector<2x256xf32>,
    return
  }
  func.func @transform_0(%arg0: i32, %arg1: i32) -> (i32, i32) {
    %c0_i32 = arith.constant 0 : i32
    return %arg1, %arg0 : i32, i32
  }
  func.func @transform_1(%arg0: i32, %arg1: i32) -> (i32, i32) {
    %c0_i32 = arith.constant 0 : i32
    %c0_i32_0 = arith.constant 0 : i32
    return %c0_i32, %arg0 : i32, i32
  }
  func.func @transform_2(%arg0: i32, %arg1: i32) -> (i32, i32) {
    %c0_i32 = arith.constant 0 : i32
    return %arg1, %arg0 : i32, i32
  }
}

</mosaic_0001>

<bundles_post_ra>
// kernel: tpu_custom_call.1
= control target key start
LH: loop header
LB: loop body
LE: loop exit
PB: predicated region body
PF: predicated region fallthrough
CT: control target
= control target key end

     0   :  { %7 = vsyncpa [#allocation3], 0  ;;  %s135_s0 = inlined_call_operand.hbm [shape: f32[2,256], index: 0, kind: input, shape index: {}, may-alias: {0,2}]   ;;  %s136_s1 = inlined_call_operand.vmem [shape: f32[1,256], index: 1, kind: input, shape index: {}]   ;;  %s137_s2 = inlined_call_operand.hbm [shape: f32[2,256], index: 2, kind: output, shape index: {}, may-alias: {0,2}]  }
   0x1   :  { %8 = vsyncpa [#allocation4], 0  ;;  %s108_s9 = smov [#allocation2]  }
   0x2   :  { %s15_s10 = sshll.u32 %s108_s9, 4  ;;  %s16_s10 = int_to_ptr.vmem [resolvable:$true] %s15_s10 }
   0x3   :  { %s72_s11 = scalar_lea.vmem %s16_s10, 64  ;;  %p77_p1 = scmp.lt.s32.totalorder %s16_s10, %s16_s10 }
   0x4   :  { %p73_p0 = scmp.ne.s32.totalorder %s16_s10, %s72_s11  ;;  %p78_p2 = scmp.lt.s32.totalorder %s72_s11, %s72_s11 }
   0x6   :  { %p79_p3 = por %p78_p2, %p77_p1 }
   0x8   :  { %p80_p4 = pnand %p79_p3, %p73_p0 }
   0xa   :  { %83 = shalt.err (!%p80_p4)
}
   0xb   :  { %18 = dma.hbm_to_vmem [thread:$0]  %s135_s0, 64, %s16_s10, [#allocation3]  }
   0xc   :  { %104 = dma.done.wait [#allocation3], 64  }
   0xd   :  { %105 = vsyncadd [#allocation3], 4294967232  ;;  %v27_v0 = vlaneseq  ;;  %v109_v1 = vmov 1983009808   ;;  %v25_v7 = vld [vmem:[%s136_s1] sm:$0x3] }
   0xe   :  { %v37_v2 = vunpack.c.l.s4 %v109_v1  ;;  %v24_v12 = vld [vmem:[#allocation2] sm:$0xf]  ;;  %s110_s16 = smov [#allocation5]  }
   0xf   :  { %v28_v3 = vshrl.u32 %v27_v0, 7  ;;  %s52_s0 = sshll.u32 %s110_s16, 4  ;;  %s53_s0 = int_to_ptr.vmem [resolvable:$true] %s52_s0 }
  0x10   :  { %v38_v6 = vunpack.c.0.s8 %v37_v2  ;;  %s84_s17 = scalar_lea.vmem %s53_s0, 64  ;;  %p89_p6 = scmp.lt.s32.totalorder %s53_s0, %s53_s0 }
  0x11   :  { %v29_v4 = vsub.s32 0, %v28_v3  ;;  %v33_v5 = vsub.s32 1, %v28_v3  ;;  %p85_p5 = scmp.ne.s32.totalorder %s53_s0, %s84_s17  ;;  %p90_p7 = scmp.lt.s32.totalorder %s84_s17, %s84_s17 }
  0x12   :  { %v41_v10 = vsub.s32 %v38_v6, %v28_v3 }
  0x13   :  { %v30_v8 = vrot.slane %v25_v7, %v29_v4  ;;  %v34_v9 = vrot.slane %v25_v7, %v33_v5  ;;  %p91_p8 = por %p90_p7, %p89_p6 }
  0x15   :  { %v35_v11 = vcombine.low %v30_v8, %v34_v9  ;;  %p92_p9 = pnand %p91_p8, %p85_p5 }
  0x17   :  { %v42_v13 = vrot.slane %v35_v11, %v41_v10 }
  0x19   :  { %v44_v14 = vadd.f32 %v42_v13, %v24_v12 }
  0x1b   :  { %45 = vst [vmem:[#allocation5] sm:$0xf] %v44_v14 }
  0x1c   :  { %95 = shalt.err (!%p92_p9)
}
  0x1d   :  { %55 = dma.vmem_to_hbm [thread:$0]  %s53_s0, 64, %s137_s2, [#allocation4]  }
  0x1e   :  { %106 = dma.done.wait [#allocation4], 64  }
  0x1f   :  { %107 = vsyncadd [#allocation4], 4294967232 }
  0x20   :  { %59 = vsyncpa [#allocation3], 1 }
  0x21   :  { %60 = vsyncpa [#allocation4], 1 }

// kernel: tpu_custom_call.1
= control target key start
LH: loop header
LB: loop body
LE: loop exit
PB: predicated region body
PF: predicated region fallthrough
CT: control target
= control target key end

     0   :  { %7 = vsyncpa [#allocation3], 0  ;;  %s135_s0 = inlined_call_operand.hbm [shape: f32[2,256], index: 0, kind: input, shape index: {}, may-alias: {0,2}]   ;;  %s136_s1 = inlined_call_operand.vmem [shape: f32[1,256], index: 1, kind: input, shape index: {}]   ;;  %s137_s2 = inlined_call_operand.hbm [shape: f32[2,256], index: 2, kind: output, shape index: {}, may-alias: {0,2}]  }
   0x1   :  { %8 = vsyncpa [#allocation4], 0  ;;  %s108_s9 = smov [#allocation2]  }
   0x2   :  { %s15_s10 = sshll.u32 %s108_s9, 4  ;;  %s16_s10 = int_to_ptr.vmem [resolvable:$true] %s15_s10 }
   0x3   :  { %s72_s11 = scalar_lea.vmem %s16_s10, 64  ;;  %p77_p1 = scmp.lt.s32.totalorder %s16_s10, %s16_s10 }
   0x4   :  { %p73_p0 = scmp.ne.s32.totalorder %s16_s10, %s72_s11  ;;  %p78_p2 = scmp.lt.s32.totalorder %s72_s11, %s72_s11 }
   0x6   :  { %p79_p3 = por %p78_p2, %p77_p1 }
   0x8   :  { %p80_p4 = pnand %p79_p3, %p73_p0 }
   0xa   :  { %83 = shalt.err (!%p80_p4)
}
   0xb   :  { %18 = dma.hbm_to_vmem [thread:$0]  %s135_s0, 64, %s16_s10, [#allocation3]  }
   0xc   :  { %104 = dma.done.wait [#allocation3], 64  }
   0xd   :  { %105 = vsyncadd [#allocation3], 4294967232  ;;  %v27_v0 = vlaneseq  ;;  %v109_v1 = vmov 1983009808   ;;  %v25_v7 = vld [vmem:[%s136_s1] sm:$0x3] }
   0xe   :  { %v37_v2 = vunpack.c.l.s4 %v109_v1  ;;  %v24_v12 = vld [vmem:[#allocation2] sm:$0xf]  ;;  %s110_s16 = smov [#allocation5]  }
   0xf   :  { %v28_v3 = vshrl.u32 %v27_v0, 7  ;;  %s52_s0 = sshll.u32 %s110_s16, 4  ;;  %s53_s0 = int_to_ptr.vmem [resolvable:$true] %s52_s0 }
  0x10   :  { %v38_v6 = vunpack.c.0.s8 %v37_v2  ;;  %s84_s17 = scalar_lea.vmem %s53_s0, 64  ;;  %p89_p6 = scmp.lt.s32.totalorder %s53_s0, %s53_s0 }
  0x11   :  { %v29_v4 = vsub.s32 0, %v28_v3  ;;  %v33_v5 = vsub.s32 1, %v28_v3  ;;  %p85_p5 = scmp.ne.s32.totalorder %s53_s0, %s84_s17  ;;  %p90_p7 = scmp.lt.s32.totalorder %s84_s17, %s84_s17 }
  0x12   :  { %v41_v10 = vsub.s32 %v38_v6, %v28_v3 }
  0x13   :  { %v30_v8 = vrot.slane %v25_v7, %v29_v4  ;;  %v34_v9 = vrot.slane %v25_v7, %v33_v5  ;;  %p91_p8 = por %p90_p7, %p89_p6 }
  0x15   :  { %v35_v11 = vcombine.low %v30_v8, %v34_v9  ;;  %p92_p9 = pnand %p91_p8, %p85_p5 }
  0x17   :  { %v42_v13 = vrot.slane %v35_v11, %v41_v10 }
  0x19   :  { %v44_v14 = vadd.f32 %v42_v13, %v24_v12 }
  0x1b   :  { %45 = vst [vmem:[#allocation5] sm:$0xf] %v44_v14 }
  0x1c   :  { %95 = shalt.err (!%p92_p9)
}
  0x1d   :  { %55 = dma.vmem_to_hbm [thread:$0]  %s53_s0, 64, %s137_s2, [#allocation4]  }
  0x1e   :  { %106 = dma.done.wait [#allocation4], 64  }
  0x1f   :  { %107 = vsyncadd [#allocation4], 4294967232 }
  0x20   :  { %59 = vsyncpa [#allocation3], 1 }
  0x21   :  { %60 = vsyncpa [#allocation4], 1 }

</bundles_post_ra>
